<compile_context>
chip_gen: v7x
topology: tpu7x:2x2x1
jax: 0.10.0
libtpu: 0.0.40
codegen_flags: <defaults>
</compile_context>

<pallas_src>
import functools

import jax
import jax.numpy as jnp
from jax.experimental import pallas as pl
from jax.experimental.pallas import tpu as pltpu


H1_DIM = 512
H2_DIM = 256
NEG_SLOPE = 0.2


def _round_up(x, m):
    return ((x + m - 1) // m) * m


def _discriminator_kernel(x_ref, w1_ref, b1_ref, w2_ref, b2_ref, w3_ref, b3_ref,
                          out_ref, h1_scratch):
    """One batch tile of the 3-layer MLP. Weights are VMEM-resident; b3 in SMEM."""
    # Layer 1: Linear(D, 512) + LeakyReLU(0.2). bf16 MXU inputs, f32 accumulate.
    x = x_ref[...].astype(jnp.bfloat16)                                   # (TB, Dp)
    h1 = jnp.dot(x, w1_ref[...], preferred_element_type=jnp.float32)      # (TB, 512)
    h1 = h1 + b1_ref[...]
    h1_scratch[...] = jnp.where(h1 > 0, h1, NEG_SLOPE * h1)

    # Layer 2: Linear(512, 256) + LeakyReLU(0.2).
    h2 = jnp.dot(h1_scratch[...].astype(jnp.bfloat16), w2_ref[...],
                 preferred_element_type=jnp.float32)                       # (TB, 256)
    h2 = h2 + b2_ref[...]
    h2 = jnp.where(h2 > 0, h2, NEG_SLOPE * h2)

    # Layer 3: Linear(256, 1) as a VPU multiply + lane reduction (MXU-free).
    out = jnp.sum(h2 * w3_ref[...], axis=-1, keepdims=True) + b3_ref[0, 0]  # (TB, 1)
    out_ref[...] = out.astype(out_ref.dtype)


@functools.partial(jax.jit, static_argnames=("tb",))
def discriminator_forward(img, params, *, tb=256):
    """img: (B, C, H, W) float32.  Returns validity logits (B, 1) float32."""
    w1, b1, w2, b2, w3, b3 = params          # (in,out) weights, (1,out) biases, f32
    B = img.shape[0]
    D = w1.shape[0]

    # ---- wrapper-side layout prep (plain JAX glue) ----
    x_flat = img.reshape(B, -1).astype(jnp.float32)                       # (B, D)

    # Pad feature dim to a lane-aligned multiple of 128 (zero cols/rows => exact).
    Dp = _round_up(D, 128)
    if Dp != D:
        x_flat = jnp.pad(x_flat, ((0, 0), (0, Dp - D)))
        w1 = jnp.pad(w1, ((0, Dp - D), (0, 0)))

    # Batch tile: multiple of 8 sublanes, capped at `tb`; pad batch to a multiple.
    TB = min(tb, _round_up(B, 8))
    Bp = _round_up(B, TB)
    if Bp != B:
        x_flat = jnp.pad(x_flat, ((0, Bp - B), (0, 0)))

    # bf16 weights for the MXU; biases / w3-row / b3 stay f32.
    w1_bf = w1.astype(jnp.bfloat16)                                       # (Dp, 512)
    w2_bf = w2.astype(jnp.bfloat16)                                       # (512, 256)
    w3_row = w3.reshape(1, H2_DIM).astype(jnp.float32)                    # (1, 256)
    b3_s = b3.reshape(1, 1).astype(jnp.float32)                           # SMEM scalar

    grid = (Bp // TB,)

    flops = 2 * Bp * (Dp * H1_DIM + H1_DIM * H2_DIM + H2_DIM)
    bytes_accessed = (4 * Bp * Dp + 2 * Dp * H1_DIM + 2 * H1_DIM * H2_DIM
                      + 4 * (H1_DIM + H2_DIM + H2_DIM + 1) + 4 * Bp)

    out = pl.pallas_call(
        _discriminator_kernel,
        out_shape=jax.ShapeDtypeStruct((Bp, 1), jnp.float32),
        grid=grid,
        in_specs=[
            pl.BlockSpec((TB, Dp), lambda i: (i, 0)),                     # x tile
            pl.BlockSpec((Dp, H1_DIM), lambda i: (0, 0)),                 # W1 (resident)
            pl.BlockSpec((1, H1_DIM), lambda i: (0, 0)),                  # b1
            pl.BlockSpec((H1_DIM, H2_DIM), lambda i: (0, 0)),             # W2 (resident)
            pl.BlockSpec((1, H2_DIM), lambda i: (0, 0)),                  # b2
            pl.BlockSpec((1, H2_DIM), lambda i: (0, 0)),                  # W3 row
            pl.BlockSpec(memory_space=pltpu.MemorySpace.SMEM),            # b3 scalar
        ],
        out_specs=pl.BlockSpec((TB, 1), lambda i: (i, 0)),
        scratch_shapes=[pltpu.VMEM((TB, H1_DIM), jnp.float32)],           # h1 staging
        compiler_params=pltpu.CompilerParams(
            dimension_semantics=("parallel",)),
        cost_estimate=pl.CostEstimate(flops=flops, transcendentals=0,
                                      bytes_accessed=bytes_accessed),
    )(x_flat, w1_bf, b1, w2_bf, b2, w3_row, b3_s)

    return out[:B]


def init_params(key, in_features):
    """Deterministic init mimicking PyTorch nn.Linear (uniform ±1/sqrt(fan_in)).

    Returns weights already transposed to (in, out) and biases as (1, out), f32."""
    sizes = [(in_features, H1_DIM), (H1_DIM, H2_DIM), (H2_DIM, 1)]
    params = []
    for (fan_in, fan_out) in sizes:
        key, kw, kb = jax.random.split(key, 3)
        bound = 1.0 / jnp.sqrt(jnp.float32(fan_in))
        w = jax.random.uniform(kw, (fan_in, fan_out), jnp.float32, -bound, bound)
        b = jax.random.uniform(kb, (1, fan_out), jnp.float32, -bound, bound)
        params += [w, b]
    return tuple(params)


def _reference_forward(img, params):
    """Plain-JAX f32 reference for correctness checking."""
    w1, b1, w2, b2, w3, b3 = params
    x = img.reshape(img.shape[0], -1)
    h1 = x @ w1 + b1
    h1 = jnp.where(h1 > 0, h1, NEG_SLOPE * h1)
    h2 = h1 @ w2 + b2
    h2 = jnp.where(h2 > 0, h2, NEG_SLOPE * h2)
    return h2 @ w3 + b3


if __name__ == "__main__":
    # Small, module-consistent shapes: img_shape = (C, H, W) = (1, 16, 16).
    B, C, H, W = 2, 1, 16, 16
    in_features = C * H * W                     # 256

    key = jax.random.PRNGKey(0)
    key, k_img = jax.random.split(key)
    img = jax.random.normal(k_img, (B, C, H, W), jnp.float32)

    params = init_params(key, in_features)

    out = discriminator_forward(img, params)
    out = jax.block_until_ready(out)

    ref = _reference_forward(img, params)
    assert out.shape == (B, 1), f"bad shape {out.shape}"
    # bf16 MXU inputs with f32 accumulation => loose tolerance vs the f32 reference.
    assert jnp.allclose(out, ref, atol=3e-2, rtol=3e-2), "mismatch vs reference"

    print("KERNEL_OK")
</pallas_src>

<mosaic_0001>
module attributes {stable_mosaic.version = 11 : i64} {
  func.func @_discriminator_kernel(%arg0: i32, %arg1: memref<8x256xf32, #tpu.memory_space<vmem>>, %arg2: memref<256x512xbf16, #tpu.memory_space<vmem>>, %arg3: memref<1x512xf32, #tpu.memory_space<vmem>>, %arg4: memref<512x256xbf16, #tpu.memory_space<vmem>>, %arg5: memref<1x256xf32, #tpu.memory_space<vmem>>, %arg6: memref<1x256xf32, #tpu.memory_space<vmem>>, %arg7: memref<1x1xf32, #tpu.memory_space<smem>>, %arg8: memref<8x1xf32, #tpu.memory_space<vmem>>, %arg9: memref<8x512xf32, #tpu.memory_space<vmem>>) attributes {dimension_semantics = [#tpu.dimension_semantics<parallel>], iteration_bounds = array<i64: 1>, scalar_prefetch = 0 : i64, scratch_operands = 1 : i64, tpu.core_type = #tpu.core_type<tc>, window_params = [{transform_indices = @transform_0, window_bounds = array<i64: 8, 256>}, {pipeline_mode = #tpu.pipeline_mode<synchronous>, transform_indices = @transform_1, window_bounds = array<i64: 256, 512>}, {pipeline_mode = #tpu.pipeline_mode<synchronous>, transform_indices = @transform_2, window_bounds = array<i64: 1, 512>}, {pipeline_mode = #tpu.pipeline_mode<synchronous>, transform_indices = @transform_3, window_bounds = array<i64: 512, 256>}, {pipeline_mode = #tpu.pipeline_mode<synchronous>, transform_indices = @transform_4, window_bounds = array<i64: 1, 256>}, {pipeline_mode = #tpu.pipeline_mode<synchronous>, transform_indices = @transform_5, window_bounds = array<i64: 1, 256>}, {transform_indices = @transform_6, window_bounds = array<i64: 1, 1>}, {transform_indices = @transform_7, window_bounds = array<i64: 8, 1>}]} {
    %c0 = arith.constant 0 : index
    %c0_0 = arith.constant 0 : index
    %0 = vector.load %arg1[%c0, %c0_0] : memref<8x256xf32, #tpu.memory_space<vmem>>, vector<8x256xf32>
    %1 = arith.truncf %0 : vector<8x256xf32> to vector<8x256xbf16>
    %c0_1 = arith.constant 0 : index
    %c0_2 = arith.constant 0 : index
    %2 = vector.load %arg2[%c0_1, %c0_2] : memref<256x512xbf16, #tpu.memory_space<vmem>>, vector<256x512xbf16>
    %cst = arith.constant dense<0.000000e+00> : vector<8x512xf32>
    %3 = tpu.matmul %1, %2, %cst {dimension_numbers = #tpu.dot_dimension_numbers<[1], [0], [0], [1], [0, 0, 1, 1], [], []>} : vector<8x256xbf16>, vector<256x512xbf16>, vector<8x512xf32> -> vector<8x512xf32>
    %c0_3 = arith.constant 0 : index
    %c0_4 = arith.constant 0 : index
    %4 = vector.load %arg3[%c0_3, %c0_4] : memref<1x512xf32, #tpu.memory_space<vmem>>, vector<1x512xf32>
    %5 = vector.broadcast %4 : vector<1x512xf32> to vector<8x512xf32>
    %6 = arith.addf %3, %5 : vector<8x512xf32>
    %cst_5 = arith.constant 0.000000e+00 : f32
    %7 = vector.broadcast %cst_5 : f32 to vector<8x512xf32>
    %8 = arith.cmpf ogt, %6, %7 : vector<8x512xf32>
    %cst_6 = arith.constant 2.000000e-01 : f32
    %9 = vector.broadcast %cst_6 : f32 to vector<8x512xf32>
    %10 = arith.mulf %9, %6 : vector<8x512xf32>
    %11 = arith.select %8, %6, %10 : vector<8x512xi1>, vector<8x512xf32>
    %c0_7 = arith.constant 0 : index
    %c0_8 = arith.constant 0 : index
    %12 = vector.load %arg9[%c0_7, %c0_8] : memref<8x512xf32, #tpu.memory_space<vmem>>, vector<8x512xf32>
    tpu.vector_store %arg9[%c0_7, %c0_8], %11 {strides = array<i32>} : memref<8x512xf32, #tpu.memory_space<vmem>>, vector<8x512xf32>,
    %c0_9 = arith.constant 0 : index
    %c0_10 = arith.constant 0 : index
    %13 = vector.load %arg9[%c0_9, %c0_10] : memref<8x512xf32, #tpu.memory_space<vmem>>, vector<8x512xf32>
    %14 = arith.truncf %13 : vector<8x512xf32> to vector<8x512xbf16>
    %c0_11 = arith.constant 0 : index
    %c0_12 = arith.constant 0 : index
    %15 = vector.load %arg4[%c0_11, %c0_12] : memref<512x256xbf16, #tpu.memory_space<vmem>>, vector<512x256xbf16>
    %cst_13 = arith.constant dense<0.000000e+00> : vector<8x256xf32>
    %16 = tpu.matmul %14, %15, %cst_13 {dimension_numbers = #tpu.dot_dimension_numbers<[1], [0], [0], [1], [0, 0, 1, 1], [], []>} : vector<8x512xbf16>, vector<512x256xbf16>, vector<8x256xf32> -> vector<8x256xf32>
    %c0_14 = arith.constant 0 : index
    %c0_15 = arith.constant 0 : index
    %17 = vector.load %arg5[%c0_14, %c0_15] : memref<1x256xf32, #tpu.memory_space<vmem>>, vector<1x256xf32>
    %18 = vector.broadcast %17 : vector<1x256xf32> to vector<8x256xf32>
    %19 = arith.addf %16, %18 : vector<8x256xf32>
    %cst_16 = arith.constant 0.000000e+00 : f32
    %20 = vector.broadcast %cst_16 : f32 to vector<8x256xf32>
    %21 = arith.cmpf ogt, %19, %20 : vector<8x256xf32>
    %cst_17 = arith.constant 2.000000e-01 : f32
    %22 = vector.broadcast %cst_17 : f32 to vector<8x256xf32>
    %23 = arith.mulf %22, %19 : vector<8x256xf32>
    %24 = arith.select %21, %19, %23 : vector<8x256xi1>, vector<8x256xf32>
    %c0_18 = arith.constant 0 : index
    %c0_19 = arith.constant 0 : index
    %25 = vector.load %arg6[%c0_18, %c0_19] : memref<1x256xf32, #tpu.memory_space<vmem>>, vector<1x256xf32>
    %26 = vector.broadcast %25 : vector<1x256xf32> to vector<8x256xf32>
    %27 = arith.mulf %24, %26 : vector<8x256xf32>
    %cst_20 = arith.constant dense<0.000000e+00> : vector<8xf32>
    %28 = vector.multi_reduction <add>, %27, %cst_20 [1] : vector<8x256xf32> to vector<8xf32>
    %29 = vector.shape_cast %28 : vector<8xf32> to vector<8x1xf32>
    %c0_21 = arith.constant 0 : index
    %c0_22 = arith.constant 0 : index
    %30 = memref.load %arg7[%c0_21, %c0_22] : memref<1x1xf32, #tpu.memory_space<smem>>
    %31 = vector.broadcast %30 : f32 to vector<8x1xf32>
    %32 = arith.addf %29, %31 : vector<8x1xf32>
    %c0_23 = arith.constant 0 : index
    %c0_24 = arith.constant 0 : index
    %33 = vector.load %arg8[%c0_23, %c0_24] : memref<8x1xf32, #tpu.memory_space<vmem>>, vector<8x1xf32>
    tpu.vector_store %arg8[%c0_23, %c0_24], %32 {strides = array<i32>} : memref<8x1xf32, #tpu.memory_space<vmem>>, vector<8x1xf32>,
    return
  }
  func.func @transform_0(%arg0: i32) -> (i32, i32) {
    %c0_i32 = arith.constant 0 : i32
    %c0_i32_0 = arith.constant 0 : i32
    return %arg0, %c0_i32 : i32, i32
  }
  func.func @transform_1(%arg0: i32) -> (i32, i32) {
    %c0_i32 = arith.constant 0 : i32
    %c0_i32_0 = arith.constant 0 : i32
    %c0_i32_1 = arith.constant 0 : i32
    return %c0_i32, %c0_i32_0 : i32, i32
  }
  func.func @transform_2(%arg0: i32) -> (i32, i32) {
    %c0_i32 = arith.constant 0 : i32
    %c0_i32_0 = arith.constant 0 : i32
    %c0_i32_1 = arith.constant 0 : i32
    return %c0_i32, %c0_i32_0 : i32, i32
  }
  func.func @transform_3(%arg0: i32) -> (i32, i32) {
    %c0_i32 = arith.constant 0 : i32
    %c0_i32_0 = arith.constant 0 : i32
    %c0_i32_1 = arith.constant 0 : i32
    return %c0_i32, %c0_i32_0 : i32, i32
  }
  func.func @transform_4(%arg0: i32) -> (i32, i32) {
    %c0_i32 = arith.constant 0 : i32
    %c0_i32_0 = arith.constant 0 : i32
    %c0_i32_1 = arith.constant 0 : i32
    return %c0_i32, %c0_i32_0 : i32, i32
  }
  func.func @transform_5(%arg0: i32) -> (i32, i32) {
    %c0_i32 = arith.constant 0 : i32
    %c0_i32_0 = arith.constant 0 : i32
    %c0_i32_1 = arith.constant 0 : i32
    return %c0_i32, %c0_i32_0 : i32, i32
  }
  func.func @transform_6(%arg0: i32) -> (i32, i32) {
    %c0_i32 = arith.constant 0 : i32
    %c0_i32_0 = arith.constant 0 : i32
    %c0_i32_1 = arith.constant 0 : i32
    return %c0_i32, %c0_i32_0 : i32, i32
  }
  func.func @transform_7(%arg0: i32) -> (i32, i32) {
    %c0_i32 = arith.constant 0 : i32
    %c0_i32_0 = arith.constant 0 : i32
    return %arg0, %c0_i32 : i32, i32
  }
}

</mosaic_0001>

<bundles_post_ra>
// kernel: discriminator_forward.1
= control target key start
LH: loop header
LB: loop body
LE: loop exit
PB: predicated region body
PF: predicated region fallthrough
CT: control target
= control target key end

     0   :  { %vm1047_vm6 = vcmask 7168   ;;  %s1854_s1 = inlined_call_operand.vmem [shape: bf16[256,512], index: 1, kind: input, shape index: {}]   ;;  %s1855_s0 = inlined_call_operand.vmem [shape: f32[8,256], index: 0, kind: input, shape index: {}]   ;;  %s1856_s3 = inlined_call_operand.vmem [shape: bf16[512,256], index: 3, kind: input, shape index: {}]   ;;  %s1857_s2 = inlined_call_operand.vmem [shape: f32[1,512], index: 2, kind: input, shape index: {}]   ;;  %s1858_s4 = inlined_call_operand.vmem [shape: f32[1,256], index: 4, kind: input, shape index: {}]   ;;  %s1859_s5 = inlined_call_operand.vmem [shape: f32[1,256], index: 5, kind: input, shape index: {}]   ;;  %s1860_s6 = inlined_call_operand.<no memory space> [shape: f32[1,1], index: 6, kind: input, shape index: {}]   ;;  %s1861_s7 = inlined_call_operand.vmem [shape: f32[8,1], index: 7, kind: output, shape index: {}]  }
   0x1   :  { %v1187_v0 = vld [vmem:[%s1854_s1 + $0x4] ss:$16 sps:$4 sm:$0xff]   ;;  %v1189_v1 = vld [vmem:[%s1854_s1] ss:$16 sps:$4 sm:$0xff]   ;;  %v28_v13 = vld [vmem:[%s1855_s0 + $0x8] sm:$0xff] }
   0x2   :  { %437 = vmatprep.subr.bf16.mxu1 %v1187_v0  ;;  %v1190_v2 = vld [vmem:[%s1854_s1 + $0x24] ss:$16 sps:$4 sm:$0xff]   ;;  %v1192_v3 = vld [vmem:[%s1854_s1 + $0x20] ss:$16 sps:$4 sm:$0xff]   ;;  %v1461_v14 = vpack.c.bf16 %v28_v13, %v28_v13  ;;  %v1237_v45 = vld [vmem:[%s1854_s1 + $0xc] ss:$16 sps:$4 sm:$0xff]  }
   0x3   :  { %438 = vmatpush1.bf16.msra.mxu1 %v1189_v1  ;;  %v1193_v4 = vld [vmem:[%s1854_s1 + $0x44] ss:$16 sps:$4 sm:$0xff]   ;;  %v1195_v5 = vld [vmem:[%s1854_s1 + $0x40] ss:$16 sps:$4 sm:$0xff]   ;;  %v1235_v47 = vld [vmem:[%s1854_s1 + $0x8] ss:$16 sps:$4 sm:$0xff]  }
   0x4   :  { %439 = vmatprep.subr.bf16.mxu1 %v1190_v2  ;;  %v1196_v6 = vld [vmem:[%s1854_s1 + $0x64] ss:$16 sps:$4 sm:$0xff]   ;;  %v1198_v7 = vld [vmem:[%s1854_s1 + $0x60] ss:$16 sps:$4 sm:$0xff]   ;;  %469 = vmatprep.mubr.bf16.mxu1 %v1461_v14  ;;  %v1240_v49 = vld [vmem:[%s1854_s1 + $0x2c] ss:$16 sps:$4 sm:$0xff]  }
   0x5   :  { %v1199_v8 = vld [vmem:[%s1854_s1 + $0x84] ss:$16 sps:$4 sm:$0xff]   ;;  %v1201_v9 = vld [vmem:[%s1854_s1 + $0x80] ss:$16 sps:$4 sm:$0xff]   ;;  %v1238_v52 = vld [vmem:[%s1854_s1 + $0x28] ss:$16 sps:$4 sm:$0xff]  }
   0x6   :  { %v1202_v10 = vld [vmem:[%s1854_s1 + $0xa4] ss:$16 sps:$4 sm:$0xff]   ;;  %v1204_v11 = vld [vmem:[%s1854_s1 + $0xa0] ss:$16 sps:$4 sm:$0xff]   ;;  %v1243_v53 = vld [vmem:[%s1854_s1 + $0x4c] ss:$16 sps:$4 sm:$0xff]  }
   0x7   :  { %440 = vmatpush1.bf16.msra.mxu1 %v1192_v3  ;;  %v1205_v12 = vld [vmem:[%s1854_s1 + $0xc4] ss:$16 sps:$4 sm:$0xff]   ;;  %v1207_v15 = vld [vmem:[%s1854_s1 + $0xc0] ss:$16 sps:$4 sm:$0xff]   ;;  %v1241_v56 = vld [vmem:[%s1854_s1 + $0x48] ss:$16 sps:$4 sm:$0xff]  }
   0x8   :  { %441 = vmatprep.subr.bf16.mxu1 %v1193_v4  ;;  %v1208_v16 = vld [vmem:[%s1854_s1 + $0xe4] ss:$16 sps:$4 sm:$0xff]   ;;  %v1210_v17 = vld [vmem:[%s1854_s1 + $0xe0] ss:$16 sps:$4 sm:$0xff]   ;;  %v1246_v57 = vld [vmem:[%s1854_s1 + $0x6c] ss:$16 sps:$4 sm:$0xff]  }
   0x9   :  { %v1211_v18 = vld [vmem:[%s1854_s1 + $0x104] ss:$16 sps:$4 sm:$0xff]   ;;  %v1213_v19 = vld [vmem:[%s1854_s1 + $0x100] ss:$16 sps:$4 sm:$0xff]   ;;  %v1244_v60 = vld [vmem:[%s1854_s1 + $0x68] ss:$16 sps:$4 sm:$0xff]  }
   0xa   :  { %v1214_v20 = vld [vmem:[%s1854_s1 + $0x124] ss:$16 sps:$4 sm:$0xff]   ;;  %v1216_v21 = vld [vmem:[%s1854_s1 + $0x120] ss:$16 sps:$4 sm:$0xff]   ;;  %v1249_v61 = vld [vmem:[%s1854_s1 + $0x8c] ss:$16 sps:$4 sm:$0xff]  }
   0xb   :  { %442 = vmatpush1.bf16.msra.mxu1 %v1195_v5  ;;  %v1217_v22 = vld [vmem:[%s1854_s1 + $0x144] ss:$16 sps:$4 sm:$0xff]   ;;  %v1219_v23 = vld [vmem:[%s1854_s1 + $0x140] ss:$16 sps:$4 sm:$0xff]   ;;  %v1247_v0 = vld [vmem:[%s1854_s1 + $0x88] ss:$16 sps:$4 sm:$0xff]  }
   0xc   :  { %443 = vmatprep.subr.bf16.mxu1 %v1196_v6  ;;  %v1220_v24 = vld [vmem:[%s1854_s1 + $0x164] ss:$16 sps:$4 sm:$0xff]   ;;  %v1222_v25 = vld [vmem:[%s1854_s1 + $0x160] ss:$16 sps:$4 sm:$0xff]   ;;  %v1252_v1 = vld [vmem:[%s1854_s1 + $0xac] ss:$16 sps:$4 sm:$0xff]  }
   0xd   :  { %v1223_v26 = vld [vmem:[%s1854_s1 + $0x184] ss:$16 sps:$4 sm:$0xff]   ;;  %v1285_v28 = vld [vmem:[%s1856_s3] ss:$8 sps:$4 sm:$0xff]   ;;  %v1288_v31 = vld [vmem:[%s1856_s3 + $0x10] ss:$8 sps:$4 sm:$0xff]  }
   0xe   :  { %v1283_v27 = vld [vmem:[%s1856_s3 + $0x4] ss:$8 sps:$4 sm:$0xff]   ;;  %v1286_v29 = vld [vmem:[%s1856_s3 + $0x14] ss:$8 sps:$4 sm:$0xff]   ;;  %v1225_v30 = vld [vmem:[%s1854_s1 + $0x180] ss:$16 sps:$4 sm:$0xff]  }
   0xf   :  { %444 = vmatpush1.bf16.msra.mxu1 %v1198_v7  ;;  %939 = vmatprep.subr.bf16.mxu0 %v1283_v27  ;;  %v1226_v32 = vld [vmem:[%s1854_s1 + $0x1a4] ss:$16 sps:$4 sm:$0xff]   ;;  %v1228_v34 = vld [vmem:[%s1854_s1 + $0x1a0] ss:$16 sps:$4 sm:$0xff]   ;;  %v1250_v4 = vld [vmem:[%s1854_s1 + $0xa8] ss:$16 sps:$4 sm:$0xff]  }
  0x10   :  { %445 = vmatprep.subr.bf16.mxu1 %v1199_v8  ;;  %940 = vmatpush1.bf16.msra.mxu0 %v1285_v28  ;;  %v1289_v33 = vld [vmem:[%s1856_s3 + $0x24] ss:$8 sps:$4 sm:$0xff]   ;;  %v1291_v35 = vld [vmem:[%s1856_s3 + $0x20] ss:$8 sps:$4 sm:$0xff]   ;;  %v1292_v37 = vld [vmem:[%s1856_s3 + $0x34] ss:$8 sps:$4 sm:$0xff]  }
  0x11   :  { %941 = vmatprep.subr.bf16.mxu0 %v1286_v29  ;;  %v1229_v36 = vld [vmem:[%s1854_s1 + $0x1c4] ss:$16 sps:$4 sm:$0xff]   ;;  %v1231_v38 = vld [vmem:[%s1854_s1 + $0x1c0] ss:$16 sps:$4 sm:$0xff]   ;;  %v1255_v5 = vld [vmem:[%s1854_s1 + $0xcc] ss:$16 sps:$4 sm:$0xff]  }
  0x12   :  { %v1294_v39 = vld [vmem:[%s1856_s3 + $0x30] ss:$8 sps:$4 sm:$0xff]   ;;  %v1232_v40 = vld [vmem:[%s1854_s1 + $0x1e4] ss:$16 sps:$4 sm:$0xff]   ;;  %v1297_v44 = vld [vmem:[%s1856_s3 + $0x40] ss:$8 sps:$4 sm:$0xff]  }
  0x13   :  { %446 = vmatpush1.bf16.msra.mxu1 %v1201_v9  ;;  %v1295_v41 = vld [vmem:[%s1856_s3 + $0x44] ss:$8 sps:$4 sm:$0xff]   ;;  %v1234_v42 = vld [vmem:[%s1854_s1 + $0x1e0] ss:$16 sps:$4 sm:$0xff]   ;;  %v1298_v46 = vld [vmem:[%s1856_s3 + $0x54] ss:$8 sps:$4 sm:$0xff]  }
  0x14   :  { %447 = vmatprep.subr.bf16.mxu1 %v1202_v10  ;;  %942 = vmatpush1.bf16.msra.mxu0 %v1288_v31  ;;  %v27_v43 = vld [vmem:[%s1855_s0] sm:$0xff]  ;;  %v1300_v50 = vld [vmem:[%s1856_s3 + $0x50] ss:$8 sps:$4 sm:$0xff]   ;;  %v1304_v55 = vld [vmem:[%s1856_s3 + $0x74] ss:$8 sps:$4 sm:$0xff]  }
  0x15   :  { %943 = vmatprep.subr.bf16.mxu0 %v1289_v33  ;;  %v1563_v48 = vpack.c.bf16 %v27_v43, %v27_v43  ;;  %v1301_v51 = vld [vmem:[%s1856_s3 + $0x64] ss:$8 sps:$4 sm:$0xff]   ;;  %v1303_v54 = vld [vmem:[%s1856_s3 + $0x60] ss:$8 sps:$4 sm:$0xff]   ;;  %v1306_v58 = vld [vmem:[%s1856_s3 + $0x70] ss:$8 sps:$4 sm:$0xff]  }
  0x16   :  { %v1307_v59 = vld [vmem:[%s1856_s3 + $0x84] ss:$8 sps:$4 sm:$0xff]   ;;  %v1309_v62 = vld [vmem:[%s1856_s3 + $0x80] ss:$8 sps:$4 sm:$0xff]   ;;  %v1310_v63 = vld [vmem:[%s1856_s3 + $0x94] ss:$8 sps:$4 sm:$0xff]  }
  0x17   :  { %448 = vmatpush1.bf16.msra.mxu1 %v1204_v11  ;;  %v1312_v2 = vld [vmem:[%s1856_s3 + $0x90] ss:$8 sps:$4 sm:$0xff]   ;;  %v1313_v3 = vld [vmem:[%s1856_s3 + $0xa4] ss:$8 sps:$4 sm:$0xff]   ;;  %v1315_v6 = vld [vmem:[%s1856_s3 + $0xa0] ss:$8 sps:$4 sm:$0xff]  }
  0x18   :  { %449 = vmatprep.subr.bf16.mxu1 %v1205_v12  ;;  %944 = vmatpush1.bf16.msra.mxu0 %v1291_v35  ;;  %v1316_v7 = vld [vmem:[%s1856_s3 + $0xb4] ss:$8 sps:$4 sm:$0xff]   ;;  %v1253_v8 = vld [vmem:[%s1854_s1 + $0xc8] ss:$16 sps:$4 sm:$0xff]   ;;  %v1319_v11 = vld [vmem:[%s1856_s3 + $0xc4] ss:$8 sps:$4 sm:$0xff]  }
  0x19   :  { %945 = vmatprep.subr.bf16.mxu0 %v1292_v37  ;;  %v1258_v9 = vld [vmem:[%s1854_s1 + $0xec] ss:$16 sps:$4 sm:$0xff]   ;;  %v1318_v10 = vld [vmem:[%s1856_s3 + $0xb0] ss:$8 sps:$4 sm:$0xff]   ;;  %v1327_v33 = vld [vmem:[%s1856_s3 + $0xe0] ss:$8 sps:$4 sm:$0xff]   ;;  %v97_v37 = vlaneseq }
  0x1a   :  { %v1256_v12 = vld [vmem:[%s1854_s1 + $0xe8] ss:$16 sps:$4 sm:$0xff]   ;;  %v1261_v13 = vld [vmem:[%s1854_s1 + $0x10c] ss:$16 sps:$4 sm:$0xff]  }
  0x1b   :  { %450 = vmatpush1.bf16.msra.mxu1 %v1207_v15  ;;  %v1322_v15 = vld [vmem:[%s1856_s3 + $0xd4] ss:$8 sps:$4 sm:$0xff]   ;;  %v1274_v27 = vld [vmem:[%s1854_s1 + $0x1a8] ss:$16 sps:$4 sm:$0xff]  }
  0x1c   :  { %451 = vmatprep.subr.bf16.mxu1 %v1208_v16  ;;  %946 = vmatpush1.bf16.msra.mxu0 %v1294_v39  ;;  %v1259_v16 = vld [vmem:[%s1854_s1 + $0x108] ss:$16 sps:$4 sm:$0xff]   ;;  %v1279_v28 = vld [vmem:[%s1854_s1 + $0x1cc] ss:$16 sps:$4 sm:$0xff]  }
  0x1d   :  { %947 = vmatprep.subr.bf16.mxu0 %v1295_v41  ;;  %v1277_v29 = vld [vmem:[%s1854_s1 + $0x1c8] ss:$16 sps:$4 sm:$0xff]  }
  0x1e   :  { %v1280_v31 = vld [vmem:[%s1854_s1 + $0x1e8] ss:$16 sps:$4 sm:$0xff]  }
  0x1f   :  { %452 = vmatpush1.bf16.msra.mxu1 %v1210_v17  ;;  %v1264_v17 = vld [vmem:[%s1854_s1 + $0x12c] ss:$16 sps:$4 sm:$0xff]   ;;  %v1330_v35 = vld [vmem:[%s1856_s3 + $0xf0] ss:$8 sps:$4 sm:$0xff]  }
  0x20   :  { %453 = vmatprep.subr.bf16.mxu1 %v1211_v18  ;;  %948 = vmatpush1.bf16.msra.mxu0 %v1297_v44  ;;  %v1324_v18 = vld [vmem:[%s1856_s3 + $0xd0] ss:$8 sps:$4 sm:$0xff]  }
  0x21   :  { %949 = vmatprep.subr.bf16.mxu0 %v1298_v46 }
  0x23   :  { %454 = vmatpush1.bf16.msra.mxu1 %v1213_v19  ;;  %v1262_v19 = vld [vmem:[%s1854_s1 + $0x128] ss:$16 sps:$4 sm:$0xff]  }
  0x24   :  { %455 = vmatprep.subr.bf16.mxu1 %v1214_v20  ;;  %950 = vmatpush1.bf16.msra.mxu0 %v1300_v50  ;;  %v1267_v20 = vld [vmem:[%s1854_s1 + $0x14c] ss:$16 sps:$4 sm:$0xff]  }
  0x25   :  { %951 = vmatprep.subr.bf16.mxu0 %v1301_v51 }
  0x27   :  { %456 = vmatpush1.bf16.msra.mxu1 %v1216_v21  ;;  %v1265_v21 = vld [vmem:[%s1854_s1 + $0x148] ss:$16 sps:$4 sm:$0xff]  }
  0x28   :  { %457 = vmatprep.subr.bf16.mxu1 %v1217_v22  ;;  %952 = vmatpush1.bf16.msra.mxu0 %v1303_v54  ;;  %v1270_v22 = vld [vmem:[%s1854_s1 + $0x16c] ss:$16 sps:$4 sm:$0xff]  }
  0x29   :  { %953 = vmatprep.subr.bf16.mxu0 %v1304_v55  ;;  %v1331_v55 = vld [vmem:[%s1856_s3 + $0x100] ss:$8 sps:$4 sm:$0xff]  }
  0x2b   :  { %458 = vmatpush1.bf16.msra.mxu1 %v1219_v23  ;;  %v1268_v23 = vld [vmem:[%s1854_s1 + $0x168] ss:$16 sps:$4 sm:$0xff]  }
  0x2c   :  { %459 = vmatprep.subr.bf16.mxu1 %v1220_v24  ;;  %954 = vmatpush1.bf16.msra.mxu0 %v1306_v58  ;;  %v1273_v24 = vld [vmem:[%s1854_s1 + $0x18c] ss:$16 sps:$4 sm:$0xff]   ;;  %v1334_v58 = vld [vmem:[%s1856_s3 + $0x110] ss:$8 sps:$4 sm:$0xff]  }
  0x2d   :  { %955 = vmatprep.subr.bf16.mxu0 %v1307_v59  ;;  %v1339_v59 = vld [vmem:[%s1856_s3 + $0x124] ss:$8 sps:$4 sm:$0xff]  }
  0x2f   :  { %460 = vmatpush1.bf16.msra.mxu1 %v1222_v25  ;;  %v1271_v25 = vld [vmem:[%s1854_s1 + $0x188] ss:$16 sps:$4 sm:$0xff]  }
  0x30   :  { %461 = vmatprep.subr.bf16.mxu1 %v1223_v26  ;;  %956 = vmatpush1.bf16.msra.mxu0 %v1309_v62  ;;  %v1276_v26 = vld [vmem:[%s1854_s1 + $0x1ac] ss:$16 sps:$4 sm:$0xff]   ;;  %v1340_v62 = vld [vmem:[%s1856_s3 + $0x130] ss:$8 sps:$4 sm:$0xff]  }
  0x31   :  { %957 = vmatprep.subr.bf16.mxu0 %v1310_v63  ;;  %v1345_v63 = vld [vmem:[%s1856_s3 + $0x144] ss:$8 sps:$4 sm:$0xff]  }
  0x33   :  { %462 = vmatpush1.bf16.msra.mxu1 %v1225_v30  ;;  %v1282_v30 = vld [vmem:[%s1854_s1 + $0x1ec] ss:$16 sps:$4 sm:$0xff]  }
  0x34   :  { %463 = vmatprep.subr.bf16.mxu1 %v1226_v32  ;;  %958 = vmatpush1.bf16.msra.mxu0 %v1312_v2  ;;  %v1325_v32 = vld [vmem:[%s1856_s3 + $0xe4] ss:$8 sps:$4 sm:$0xff]   ;;  %v1346_v2 = vld [vmem:[%s1856_s3 + $0x150] ss:$8 sps:$4 sm:$0xff]  }
  0x35   :  { %959 = vmatprep.subr.bf16.mxu0 %v1313_v3  ;;  %v1351_v3 = vld [vmem:[%s1856_s3 + $0x164] ss:$8 sps:$4 sm:$0xff]  }
  0x37   :  { %464 = vmatpush1.bf16.msra.mxu1 %v1228_v34  ;;  %v1328_v34 = vld [vmem:[%s1856_s3 + $0xf4] ss:$8 sps:$4 sm:$0xff]  }
  0x38   :  { %465 = vmatprep.subr.bf16.mxu1 %v1229_v36  ;;  %960 = vmatpush1.bf16.msra.mxu0 %v1315_v6  ;;  %v1333_v36 = vld [vmem:[%s1856_s3 + $0x104] ss:$8 sps:$4 sm:$0xff]   ;;  %v1352_v6 = vld [vmem:[%s1856_s3 + $0x170] ss:$8 sps:$4 sm:$0xff]  }
  0x39   :  { %961 = vmatprep.subr.bf16.mxu0 %v1316_v7  ;;  %v1357_v7 = vld [vmem:[%s1856_s3 + $0x184] ss:$8 sps:$4 sm:$0xff]  }
  0x3b   :  { %466 = vmatpush1.bf16.msra.mxu1 %v1231_v38  ;;  %v1724_v38 = vshrl.u32 %v97_v37, 7 }
  0x3c   :  { %467 = vmatprep.subr.bf16.mxu1 %v1232_v40  ;;  %962 = vmatpush1.bf16.msra.mxu0 %v1318_v10  ;;  %v1732_v40 = vld [vmem:[%s1857_s2] sm:$0xf]  ;;  %v1358_v10 = vld [vmem:[%s1856_s3 + $0x190] ss:$8 sps:$4 sm:$0xff]  }
  0x3d   :  { %963 = vmatprep.subr.bf16.mxu0 %v1319_v11  ;;  %v1727_v39 = vsub.s32 0, %v1724_v38  ;;  %v1735_v41 = vsub.s32 1, %v1724_v38  ;;  %v1363_v11 = vld [vmem:[%s1856_s3 + $0x1a4] ss:$8 sps:$4 sm:$0xff]  }
  0x3f   :  { %468 = vmatpush1.bf16.msra.mxu1 %v1234_v42  ;;  %v100_v42 = vrot.slane %v1732_v40, %v1727_v39  ;;  %v104_v43 = vrot.slane %v1732_v40, %v1735_v41 }
  0x40   :  { %478 = vmatprep.subr.bf16.mxu1 %v1237_v45 }
  0x42   :  { %470 = vmatmul.mubr.bf16.vlgmr.msra.gmra.mrb[0].mxu1 %v1563_v48 }
  0x43   :  { %479 = vmatpush1.bf16.msra.mxu1 %v1235_v47  ;;  %510 = vmatprep.mubr.bf16.mxu1 %v1461_v14  ;;  %v1321_v14 = vld [vmem:[%s1856_s3 + $0xc0] ss:$8 sps:$4 sm:$0xff]  }
  0x44   :  { %480 = vmatprep.subr.bf16.mxu1 %v1240_v49  ;;  %964 = vmatpush1.bf16.msra.mxu0 %v1321_v14  ;;  %v1364_v14 = vld [vmem:[%s1856_s3 + $0x1b0] ss:$8 sps:$4 sm:$0xff]  }
  0x45   :  { %965 = vmatprep.subr.bf16.mxu0 %v1322_v15  ;;  %v1369_v15 = vld [vmem:[%s1856_s3 + $0x1c4] ss:$8 sps:$4 sm:$0xff]  }
  0x47   :  { %481 = vmatpush1.bf16.msra.mxu1 %v1238_v52 }
  0x48   :  { %482 = vmatprep.subr.bf16.mxu1 %v1243_v53  ;;  %966 = vmatpush1.bf16.msra.mxu0 %v1324_v18  ;;  %v107_v18 = vsub.s32 2, %v1724_v38 }
  0x49   :  { %967 = vmatprep.subr.bf16.mxu0 %v1325_v32 }
  0x4b   :  { %483 = vmatpush1.bf16.msra.mxu1 %v1241_v56 }
  0x4c   :  { %484 = vmatprep.subr.bf16.mxu1 %v1246_v57  ;;  %968 = vmatpush1.bf16.msra.mxu0 %v1327_v33  ;;  %v1336_v57 = vld [vmem:[%s1856_s3 + $0x114] ss:$8 sps:$4 sm:$0xff]   ;;  %v1376_v33 = vld [vmem:[%s1856_s3 + $0x1f0] ss:$8 sps:$4 sm:$0xff]  }
  0x4d   :  { %969 = vmatprep.subr.bf16.mxu0 %v1328_v34 }
  0x4f   :  { %485 = vmatpush1.bf16.msra.mxu1 %v1244_v60  ;;  %v1337_v60 = vld [vmem:[%s1856_s3 + $0x120] ss:$8 sps:$4 sm:$0xff]  }
  0x50   :  { %486 = vmatprep.subr.bf16.mxu1 %v1249_v61  ;;  %970 = vmatpush1.bf16.msra.mxu0 %v1330_v35  ;;  %v1342_v61 = vld [vmem:[%s1856_s3 + $0x134] ss:$8 sps:$4 sm:$0xff]  }
  0x51   :  { %980 = vmatprep.subr.bf16.mxu0 %v1333_v36 }
  0x53   :  { %487 = vmatpush1.bf16.msra.mxu1 %v1247_v0  ;;  %v1343_v0 = vld [vmem:[%s1856_s3 + $0x140] ss:$8 sps:$4 sm:$0xff]  }
  0x54   :  { %488 = vmatprep.subr.bf16.mxu1 %v1252_v1  ;;  %v1348_v1 = vld [vmem:[%s1856_s3 + $0x154] ss:$8 sps:$4 sm:$0xff]  }
  0x57   :  { %489 = vmatpush1.bf16.msra.mxu1 %v1250_v4  ;;  %v1349_v4 = vld [vmem:[%s1856_s3 + $0x160] ss:$8 sps:$4 sm:$0xff]  }
  0x58   :  { %490 = vmatprep.subr.bf16.mxu1 %v1255_v5  ;;  %v1354_v5 = vld [vmem:[%s1856_s3 + $0x174] ss:$8 sps:$4 sm:$0xff]  }
  0x5b   :  { %491 = vmatpush1.bf16.msra.mxu1 %v1253_v8  ;;  %v1355_v8 = vld [vmem:[%s1856_s3 + $0x180] ss:$8 sps:$4 sm:$0xff]  }
  0x5c   :  { %492 = vmatprep.subr.bf16.mxu1 %v1258_v9  ;;  %v1360_v9 = vld [vmem:[%s1856_s3 + $0x194] ss:$8 sps:$4 sm:$0xff]  }
  0x5f   :  { %493 = vmatpush1.bf16.msra.mxu1 %v1256_v12  ;;  %v1361_v12 = vld [vmem:[%s1856_s3 + $0x1a0] ss:$8 sps:$4 sm:$0xff]  }
  0x60   :  { %494 = vmatprep.subr.bf16.mxu1 %v1261_v13  ;;  %v1366_v13 = vld [vmem:[%s1856_s3 + $0x1b4] ss:$8 sps:$4 sm:$0xff]  }
  0x63   :  { %495 = vmatpush1.bf16.msra.mxu1 %v1259_v16  ;;  %v1367_v16 = vld [vmem:[%s1856_s3 + $0x1c0] ss:$8 sps:$4 sm:$0xff]  }
  0x64   :  { %496 = vmatprep.subr.bf16.mxu1 %v1264_v17  ;;  %v1372_v17 = vld [vmem:[%s1856_s3 + $0x1d4] ss:$8 sps:$4 sm:$0xff]  }
  0x67   :  { %497 = vmatpush1.bf16.msra.mxu1 %v1262_v19  ;;  %v111_v19 = vsub.s32 3, %v1724_v38 }
  0x68   :  { %498 = vmatprep.subr.bf16.mxu1 %v1267_v20  ;;  %v1370_v20 = vld [vmem:[%s1856_s3 + $0x1d0] ss:$8 sps:$4 sm:$0xff]  }
  0x6b   :  { %499 = vmatpush1.bf16.msra.mxu1 %v1265_v21  ;;  %v1375_v21 = vld [vmem:[%s1856_s3 + $0x1e4] ss:$8 sps:$4 sm:$0xff]  }
  0x6c   :  { %500 = vmatprep.subr.bf16.mxu1 %v1270_v22  ;;  %v108_v22 = vrot.slane %v1732_v40, %v107_v18 }
  0x6f   :  { %501 = vmatpush1.bf16.msra.mxu1 %v1268_v23  ;;  %v112_v23 = vrot.slane %v1732_v40, %v111_v19  ;;  %v607_v40 = vld [vmem:[%s1858_s4] sm:$0x3] }
  0x70   :  { %502 = vmatprep.subr.bf16.mxu1 %v1273_v24  ;;  %v1373_v24 = vld [vmem:[%s1856_s3 + $0x1e0] ss:$8 sps:$4 sm:$0xff]  }
  0x73   :  { %503 = vmatpush1.bf16.msra.mxu1 %v1271_v25 }
  0x74   :  { %504 = vmatprep.subr.bf16.mxu1 %v1276_v26  ;;  %v1378_v26 = vld [vmem:[%s1856_s3 + $0x1f4] ss:$8 sps:$4 sm:$0xff]  }
  0x77   :  { %505 = vmatpush1.bf16.msra.mxu1 %v1274_v27 }
  0x78   :  { %506 = vmatprep.subr.bf16.mxu1 %v1279_v28 }
  0x7b   :  { %507 = vmatpush1.bf16.msra.mxu1 %v1277_v29 }
  0x7c   :  { %508 = vmatprep.subr.bf16.mxu1 %v1282_v30 }
  0x7f   :  { %509 = vmatpush1.bf16.msra.mxu1 %v1280_v31 }
  0x82   :  { %511 = vmatmul.mubr.bf16.vlgmr.msra.gmra.mrb[4].mxu1 %v1563_v48 }
 0x115   :  { %v471_v44 = vpop.f32.mrb[0].mxu1 }
 0x116   :  { %v472_v45 = vadd.f32 %v471_v44, %v100_v42  ;;  %v473_v46 = vpop.f32.mrb[1].mxu1  ;;  %v612_v42 = vrot.slane %v607_v40, %v1727_v39  ;;  %v1027_v44 = vld [vmem:[%s1859_s5] sm:$0x3] }
 0x117   :  { %v474_v47 = vadd.f32 %v473_v46, %v104_v43  ;;  %v475_v48 = vpop.f32.mrb[2].mxu1  ;;  %v616_v43 = vrot.slane %v607_v40, %v1735_v41 }
 0x118   :  { %vm519_vm0 = vcmp.gt.f32.partialorder %v472_v45, 0.0  ;;  %v523_v49 = vmul.f32 0.2, %v472_v45  ;;  %v476_v50 = vpop.f32.mrb[3].mxu1 }
 0x119   :  { %vm520_vm1 = vcmp.gt.f32.partialorder %v474_v47, 0.0  ;;  %v524_v51 = vmul.f32 0.2, %v474_v47  ;;  %v1032_v50 = vrot.slane %v1027_v44, %v1727_v39 }
 0x11a   :  { %v527_v52 = vsel %vm519_vm0, %v472_v45, %v523_v49 }
 0x11b   :  { %v528_v53 = vsel %vm520_vm1, %v474_v47, %v524_v51  ;;  %v539_v56 = vpack.c.bf16 %v527_v52, %v527_v52 }
 0x11c   :  { %v540_v54 = vpack.c.bf16 %v528_v53, %v528_v53  ;;  %v1036_v53 = vrot.slane %v1027_v44, %v1735_v41 }
 0x11e   :  { %971 = vmatprep.mubr.bf16.mxu0 %v540_v54 }
 0x11f   :  { %972 = vmatmul.mubr.bf16.vlgmr.msra.gmra.mrb[0].mxu0 %v539_v56 }
 0x120   :  { %981 = vmatpush1.bf16.msra.mxu0 %v1331_v55 }
 0x121   :  { %982 = vmatprep.subr.bf16.mxu0 %v1336_v57 }
 0x124   :  { %983 = vmatpush1.bf16.msra.mxu0 %v1334_v58 }
 0x125   :  { %984 = vmatprep.subr.bf16.mxu0 %v1339_v59 }
 0x128   :  { %985 = vmatpush1.bf16.msra.mxu0 %v1337_v60  ;;  %v1045_v60 = vstv %s1860_s6 }
 0x129   :  { %986 = vmatprep.subr.bf16.mxu0 %v1342_v61 }
 0x12c   :  { %987 = vmatpush1.bf16.msra.mxu0 %v1340_v62 }
 0x12d   :  { %988 = vmatprep.subr.bf16.mxu0 %v1345_v63 }
 0x130   :  { %989 = vmatpush1.bf16.msra.mxu0 %v1343_v0 }
 0x131   :  { %990 = vmatprep.subr.bf16.mxu0 %v1348_v1 }
 0x134   :  { %991 = vmatpush1.bf16.msra.mxu0 %v1346_v2 }
 0x135   :  { %992 = vmatprep.subr.bf16.mxu0 %v1351_v3 }
 0x138   :  { %993 = vmatpush1.bf16.msra.mxu0 %v1349_v4 }
 0x139   :  { %994 = vmatprep.subr.bf16.mxu0 %v1354_v5 }
 0x13c   :  { %995 = vmatpush1.bf16.msra.mxu0 %v1352_v6 }
 0x13d   :  { %996 = vmatprep.subr.bf16.mxu0 %v1357_v7 }
 0x140   :  { %997 = vmatpush1.bf16.msra.mxu0 %v1355_v8 }
 0x141   :  { %998 = vmatprep.subr.bf16.mxu0 %v1360_v9 }
 0x144   :  { %999 = vmatpush1.bf16.msra.mxu0 %v1358_v10 }
 0x145   :  { %1000 = vmatprep.subr.bf16.mxu0 %v1363_v11 }
 0x148   :  { %1001 = vmatpush1.bf16.msra.mxu0 %v1361_v12 }
 0x149   :  { %1002 = vmatprep.subr.bf16.mxu0 %v1366_v13 }
 0x14c   :  { %1003 = vmatpush1.bf16.msra.mxu0 %v1364_v14 }
 0x14d   :  { %1004 = vmatprep.subr.bf16.mxu0 %v1369_v15 }
 0x150   :  { %1005 = vmatpush1.bf16.msra.mxu0 %v1367_v16 }
 0x151   :  { %1006 = vmatprep.subr.bf16.mxu0 %v1372_v17 }
 0x154   :  { %1007 = vmatpush1.bf16.msra.mxu0 %v1370_v20 }
 0x155   :  { %v512_v25 = vpop.f32.mrb[4].mxu1  ;;  %1008 = vmatprep.subr.bf16.mxu0 %v1375_v21 }
 0x156   :  { %v513_v27 = vadd.f32 %v512_v25, %v108_v22  ;;  %v514_v28 = vpop.f32.mrb[5].mxu1 }
 0x157   :  { %v515_v29 = vadd.f32 %v514_v28, %v112_v23  ;;  %v516_v30 = vpop.f32.mrb[6].mxu1 }
 0x158   :  { %vm521_vm2 = vcmp.gt.f32.partialorder %v513_v27, 0.0  ;;  %v525_v31 = vmul.f32 0.2, %v513_v27  ;;  %v517_v32 = vpop.f32.mrb[7].mxu1  ;;  %1009 = vmatpush1.bf16.msra.mxu0 %v1373_v24 }
 0x159   :  { %vm522_vm3 = vcmp.gt.f32.partialorder %v515_v29, 0.0  ;;  %v526_v34 = vmul.f32 0.2, %v515_v29  ;;  %1010 = vmatprep.subr.bf16.mxu0 %v1378_v26 }
 0x15a   :  { %v529_v35 = vsel %vm521_vm2, %v513_v27, %v525_v31 }
 0x15b   :  { %v530_v36 = vsel %vm522_vm3, %v515_v29, %v526_v34  ;;  %v541_v38 = vpack.c.bf16 %v529_v35, %v529_v35 }
 0x15c   :  { %1011 = vmatpush1.bf16.msra.mxu0 %v1376_v33  ;;  %v542_v37 = vpack.c.bf16 %v530_v36, %v530_v36 }
 0x15e   :  { %1012 = vmatprep.mubr.bf16.mxu0 %v542_v37 }
 0x15f   :  { %1013 = vmatmul.mubr.bf16.vlgmr.msra.gmra.mrb[0].mxu0 %v541_v38 }
 0x232   :  { %v1014_v45 = vpop.f32.mrb[0].mxu0 }
 0x233   :  { %v1181_v46 = vadd.f32 %v1014_v45, %v612_v42  ;;  %v1016_v47 = vpop.f32.mrb[1].mxu0 }
 0x234   :  { %v1182_v48 = vadd.f32 %v1016_v47, %v616_v43  ;;  %v1018_v49 = vpop.f32.mrb[2].mxu0 }
 0x235   :  { %vm1021_vm4 = vcmp.gt.f32.partialorder %v1181_v46, 0.0  ;;  %v1023_v51 = vmul.f32 0.2, %v1181_v46  ;;  %v1019_v52 = vpop.f32.mrb[3].mxu0 }
 0x236   :  { %vm1022_vm5 = vcmp.gt.f32.partialorder %v1182_v48, 0.0  ;;  %v1024_v54 = vmul.f32 0.2, %v1182_v48 }
 0x237   :  { %v1025_v55 = vsel %vm1021_vm4, %v1181_v46, %v1023_v51 }
 0x238   :  { %v1026_v56 = vsel %vm1022_vm5, %v1182_v48, %v1024_v54  ;;  %v1039_v57 = vmul.f32 %v1032_v50, %v1025_v55 }
 0x239   :  { %v1040_v58 = vmul.f32 %v1036_v53, %v1026_v56 }
 0x23b   :  { %v1041_v59 = vadd.f32 %v1040_v58, %v1039_v57 }
 0x23d   :  { %1042 = vadd.xlane.f32.xlu0 %v1041_v59 }
 0x2ca   :  { %v1043_v61 = vpop.xlane.xlu0 %1042 }
 0x2cb   :  { %v1046_v39 = vadd.f32 %v1045_v60, %v1043_v61 }
 0x2cd   :  { %1048 = vst.msk [vmem:[%s1861_s7] sm:$0xff] %vm1047_vm6, %v1046_v39 }

</bundles_post_ra>
